<compile_context>
chip_gen: v7x
topology: tpu7x:2x2x1
jax: 0.10.0
libtpu: 0.0.40
codegen_flags: <defaults>
</compile_context>

<pallas_src>
import math

import jax
import jax.numpy as jnp
from jax.experimental import pallas as pl
from jax.experimental.pallas import tpu as pltpu


def _mtb_kernel(x_ref, s_ref, b_ref, r_ref, o_ref):
    # x_ref: [1, TB, K]  feature slice of the batch tile
    # s_ref: [1, 1, K]   0.5 * scales / temperature for this feature slice
    # b_ref: [1, 1, TN]  0.5 * thresholds / temperature (i-major, t-minor)
    # r_ref: [K, TN]     replication matrix R[k, k*T + t] = 1 (resident, tiny)
    # o_ref: [TB, TN]    lane-dense output block
    xs = x_ref[0] * s_ref[0]                                            # VPU, [TB, K]
    z = jnp.dot(xs, r_ref[...], preferred_element_type=jnp.float32)    # MXU broadcast
    z = z - b_ref[0]
    # sigmoid(u) == 0.5 * tanh(u/2) + 0.5 ; the 1/2 is already folded into s, b.
    o_ref[...] = (0.5 * jnp.tanh(z) + 0.5).astype(o_ref.dtype)


def _round_up(v, m):
    return ((v + m - 1) // m) * m


_TARGET_BLOCK_BYTES = 6 * 1024 * 1024   # per-buffer output block target
_MAX_R_BYTES = 2 * 1024 * 1024          # cap on the resident replication matrix
_MAX_TB = 2048


def _choose_tiles(B, DT, T, out_itemsize):
    """Pick (TB, TN): batch rows / output columns per block."""
    base = (128 * T) // math.gcd(128, T)            # lcm(128, T): lane-dense, whole features
    # --- column tile
    if DT <= base:
        TN = DT                                     # single full-width tile (== full dim: legal)
    else:
        eff_tb = B if B <= 8 else min(_round_up(B, 8), _MAX_TB)
        if B >= 16:
            eff_tb = min(eff_tb, _round_up(pl.cdiv(B, 2), 8))
        m_target = max(1, _TARGET_BLOCK_BYTES // (eff_tb * base * out_itemsize))
        m_rcap = max(1, int(math.isqrt(_MAX_R_BYTES * T // 4)) // base)   # R = 4*TN^2/T bytes
        m = max(1, min(DT // base, m_target, m_rcap))
        TN = base * m
    # --- batch tile
    if B <= 8:
        TB = B
    else:
        tb = max(8, (_TARGET_BLOCK_BYTES // (TN * out_itemsize)) // 8 * 8)
        if B >= 16:
            tb = min(tb, _round_up(pl.cdiv(B, 2), 8))     # >= 2 grid tiles for 2-TC v7x
        TB = max(8, min(tb, _round_up(B, 8), _MAX_TB))
        if TB >= B:
            TB = B                                        # single full-extent batch block
    return TB, TN


def multi_threshold_binarization(x, thresholds, scales, temperature,
                                 *, out_dtype=jnp.float32):
    """x: [B, D], thresholds: [D, T], scales: [D]  ->  [B, D*T] (i-major, t-minor)."""
    B, D = x.shape
    d_check, T = thresholds.shape
    assert D == d_check and scales.shape == (D,)
    DT = D * T
    half_inv_temp = 0.5 / float(temperature)

    x = x.astype(jnp.float32)
    thresholds = thresholds.astype(jnp.float32)
    scales = scales.astype(jnp.float32)

    # Lane-density fold: if D*T < 128, fold G batch rows into the feature axis.
    # [B/G, G*D*T] has the identical HBM layout as [B, D*T], so the reshapes are free.
    G = 1
    if DT < 128 and B > 1:
        G = math.gcd(B, max(1, 128 // DT))
    if G > 1:
        B2, D2 = B // G, G * D
        x2 = x.reshape(B2, D2)
        scales2 = jnp.tile(scales, (G,))
        thresholds2 = jnp.tile(thresholds, (G, 1))
    else:
        B2, D2, x2, scales2, thresholds2 = B, D, x, scales, thresholds
    DT2 = D2 * T

    out_itemsize = jnp.dtype(out_dtype).itemsize
    TB, TN = _choose_tiles(B2, DT2, T, out_itemsize)
    K = TN // T                         # features covered by one column tile
    n_col = pl.cdiv(DT2, TN)            # ragged last column tile is masked by Pallas
    D_pad = n_col * K                   # pad features so every tile covers whole features

    # Parameter-side preprocessing (parameter-sized, done once).
    if D_pad != D2:
        x2 = jnp.pad(x2, ((0, 0), (0, D_pad - D2)))
        scales2 = jnp.pad(scales2, (0, D_pad - D2))
        thresholds2 = jnp.pad(thresholds2, ((0, D_pad - D2), (0, 0)))
    # x3[j, b, k] = x[b, j*K + k]  (tiny input-side transpose; output untouched)
    x3 = x2.reshape(B2, n_col, K).transpose(1, 0, 2)
    s3 = (scales2 * half_inv_temp).reshape(n_col, 1, K)
    b3 = (thresholds2 * half_inv_temp).reshape(n_col, 1, TN)
    # Shared replication matrix: R[k, k*T + t] = 1  (the diagonal block of the old E).
    r = (jnp.arange(TN, dtype=jnp.int32)[None, :] // T
         == jnp.arange(K, dtype=jnp.int32)[:, None]).astype(jnp.float32)

    grid = (pl.cdiv(B2, TB), n_col)

    # VMEM: double-buffered x / s / b / out blocks, resident R (counted twice to be
    # conservative), one f32 intermediate for the dot result, plus slack.
    vmem_need = (2 * 4 * (TB * K + K + TN + K * TN)
                 + 2 * out_itemsize * TB * TN
                 + 4 * TB * TN
                 + (4 << 20))
    vmem_limit = int(min(max(vmem_need, 16 << 20), 48 << 20))

    cost = pl.CostEstimate(
        flops=2 * B2 * DT2 * K + 5 * B2 * DT2,
        transcendentals=B2 * DT2,
        bytes_accessed=4 * (B2 * D_pad + D_pad + D_pad * T + K * TN)
                       + out_itemsize * B2 * DT2,
    )

    out = pl.pallas_call(
        _mtb_kernel,
        out_shape=jax.ShapeDtypeStruct((B2, DT2), out_dtype),
        grid_spec=pltpu.PrefetchScalarGridSpec(
            num_scalar_prefetch=0,
            grid=grid,
            in_specs=[
                pl.BlockSpec((1, TB, K), lambda i, j: (j, i, 0)),   # x feature slice
                pl.BlockSpec((1, 1, K), lambda i, j: (j, 0, 0)),    # scales slice
                pl.BlockSpec((1, 1, TN), lambda i, j: (j, 0, 0)),   # thresholds slice
                pl.BlockSpec((K, TN), lambda i, j: (0, 0)),         # resident R
            ],
            out_specs=pl.BlockSpec((TB, TN), lambda i, j: (i, j)),
        ),
        compiler_params=pltpu.CompilerParams(
            dimension_semantics=("parallel", "parallel"),
            vmem_limit_bytes=vmem_limit,
        ),
        cost_estimate=cost,
    )(x3, s3, b3, r)

    return out.reshape(B, DT)


def _reference(x, thresholds, scales, temperature):
    scaled = x * scales[None, :]                              # [B, D]
    diff = scaled[:, :, None] - thresholds[None, :, :]        # [B, D, T]
    return jax.nn.sigmoid(diff / temperature).reshape(x.shape[0], -1)


if __name__ == "__main__":
    # Small shapes consistent with the module's forward pass.
    input_dim = 4
    n_thresholds = 8
    temperature = 0.1
    batch_size = 8

    # Deterministic parameter init mirroring __init__/_init_thresholds:
    #   thresholds[i] = linspace(-1, 1, n_thresholds);  scales = ones(input_dim)
    thresholds = jnp.tile(
        jnp.linspace(-1.0, 1.0, n_thresholds, dtype=jnp.float32)[None, :],
        (input_dim, 1),
    )
    scales = jnp.ones((input_dim,), dtype=jnp.float32)

    key = jax.random.PRNGKey(0)
    x = jax.random.normal(key, (batch_size, input_dim), dtype=jnp.float32)

    out = multi_threshold_binarization(x, thresholds, scales, temperature)
    out = jax.block_until_ready(out)

    ref = _reference(x, thresholds, scales, temperature)
    assert out.shape == (batch_size, input_dim * n_thresholds)
    assert jnp.allclose(out, ref, atol=1e-5, rtol=1e-5), \
        float(jnp.max(jnp.abs(out - ref)))

    # Optional bf16 output path (the kernel is HBM-write-bound); looser tolerance.
    out_bf16 = multi_threshold_binarization(
        x, thresholds, scales, temperature, out_dtype=jnp.bfloat16)
    out_bf16 = jax.block_until_ready(out_bf16)
    assert jnp.allclose(out_bf16.astype(jnp.float32), ref, atol=1e-2, rtol=1e-2)

    print("KERNEL_OK")
</pallas_src>

<mosaic_0001>
module attributes {stable_mosaic.version = 11 : i64} {
  func.func @_mtb_kernel(%arg0: i32, %arg1: i32, %arg2: memref<1x2x16xf32, #tpu.memory_space<vmem>>, %arg3: memref<1x1x16xf32, #tpu.memory_space<vmem>>, %arg4: memref<1x1x128xf32, #tpu.memory_space<vmem>>, %arg5: memref<16x128xf32, #tpu.memory_space<vmem>>, %arg6: memref<2x128xf32, #tpu.memory_space<vmem>>) attributes {dimension_semantics = [#tpu.dimension_semantics<parallel>, #tpu.dimension_semantics<parallel>], iteration_bounds = array<i64: 1, 1>, scalar_prefetch = 0 : i64, scratch_operands = 0 : i64, tpu.core_type = #tpu.core_type<tc>, window_params = [{transform_indices = @transform_0, window_bounds = array<i64: 1, 2, 16>}, {transform_indices = @transform_1, window_bounds = array<i64: 1, 1, 16>}, {transform_indices = @transform_2, window_bounds = array<i64: 1, 1, 128>}, {pipeline_mode = #tpu.pipeline_mode<synchronous>, transform_indices = @transform_3, window_bounds = array<i64: 16, 128>}, {transform_indices = @transform_4, window_bounds = array<i64: 2, 128>}]} {
    %c0 = arith.constant 0 : index
    %c0_0 = arith.constant 0 : index
    %c0_1 = arith.constant 0 : index
    %0 = vector.load %arg2[%c0, %c0_0, %c0_1] : memref<1x2x16xf32, #tpu.memory_space<vmem>>, vector<1x2x16xf32>
    %1 = vector.shape_cast %0 : vector<1x2x16xf32> to vector<2x16xf32>
    %c0_2 = arith.constant 0 : index
    %c0_3 = arith.constant 0 : index
    %c0_4 = arith.constant 0 : index
    %2 = vector.load %arg3[%c0_2, %c0_3, %c0_4] : memref<1x1x16xf32, #tpu.memory_space<vmem>>, vector<1x1x16xf32>
    %3 = vector.shape_cast %2 : vector<1x1x16xf32> to vector<1x16xf32>
    %4 = vector.broadcast %3 : vector<1x16xf32> to vector<2x16xf32>
    %5 = arith.mulf %1, %4 : vector<2x16xf32>
    %c0_5 = arith.constant 0 : index
    %c0_6 = arith.constant 0 : index
    %6 = vector.load %arg5[%c0_5, %c0_6] : memref<16x128xf32, #tpu.memory_space<vmem>>, vector<16x128xf32>
    %cst = arith.constant dense<0.000000e+00> : vector<2x128xf32>
    %7 = tpu.matmul %5, %6, %cst {dimension_numbers = #tpu.dot_dimension_numbers<[1], [0], [0], [1], [0, 0, 1, 1], [], []>} : vector<2x16xf32>, vector<16x128xf32>, vector<2x128xf32> -> vector<2x128xf32>
    %c0_7 = arith.constant 0 : index
    %c0_8 = arith.constant 0 : index
    %c0_9 = arith.constant 0 : index
    %8 = vector.load %arg4[%c0_7, %c0_8, %c0_9] : memref<1x1x128xf32, #tpu.memory_space<vmem>>, vector<1x1x128xf32>
    %9 = vector.shape_cast %8 : vector<1x1x128xf32> to vector<1x128xf32>
    %10 = vector.broadcast %9 : vector<1x128xf32> to vector<2x128xf32>
    %11 = arith.subf %7, %10 : vector<2x128xf32>
    %12 = math.tanh %11 : vector<2x128xf32>
    %cst_10 = arith.constant 5.000000e-01 : f32
    %13 = vector.broadcast %cst_10 : f32 to vector<2x128xf32>
    %14 = arith.mulf %13, %12 : vector<2x128xf32>
    %cst_11 = arith.constant 5.000000e-01 : f32
    %15 = vector.broadcast %cst_11 : f32 to vector<2x128xf32>
    %16 = arith.addf %14, %15 : vector<2x128xf32>
    %c0_12 = arith.constant 0 : index
    %c0_13 = arith.constant 0 : index
    %17 = vector.load %arg6[%c0_12, %c0_13] : memref<2x128xf32, #tpu.memory_space<vmem>>, vector<2x128xf32>
    tpu.vector_store %arg6[%c0_12, %c0_13], %16 {strides = array<i32>} : memref<2x128xf32, #tpu.memory_space<vmem>>, vector<2x128xf32>,
    return
  }
  func.func @transform_0(%arg0: i32, %arg1: i32) -> (i32, i32, i32) {
    %c0_i32 = arith.constant 0 : i32
    %c0_i32_0 = arith.constant 0 : i32
    return %arg1, %arg0, %c0_i32 : i32, i32, i32
  }
  func.func @transform_1(%arg0: i32, %arg1: i32) -> (i32, i32, i32) {
    %c0_i32 = arith.constant 0 : i32
    %c0_i32_0 = arith.constant 0 : i32
    %c0_i32_1 = arith.constant 0 : i32
    return %arg1, %c0_i32, %c0_i32_0 : i32, i32, i32
  }
  func.func @transform_2(%arg0: i32, %arg1: i32) -> (i32, i32, i32) {
    %c0_i32 = arith.constant 0 : i32
    %c0_i32_0 = arith.constant 0 : i32
    %c0_i32_1 = arith.constant 0 : i32
    return %arg1, %c0_i32, %c0_i32_0 : i32, i32, i32
  }
  func.func @transform_3(%arg0: i32, %arg1: i32) -> (i32, i32) {
    %c0_i32 = arith.constant 0 : i32
    %c0_i32_0 = arith.constant 0 : i32
    %c0_i32_1 = arith.constant 0 : i32
    return %c0_i32, %c0_i32_0 : i32, i32
  }
  func.func @transform_4(%arg0: i32, %arg1: i32) -> (i32, i32) {
    %c0_i32 = arith.constant 0 : i32
    return %arg0, %arg1 : i32, i32
  }
}

</mosaic_0001>

<bundles_post_ra>
// kernel: tpu_custom_call.1
= control target key start
LH: loop header
LB: loop body
LE: loop exit
PB: predicated region body
PF: predicated region fallthrough
CT: control target
= control target key end

     0   :  { %9 = vsyncpa [#allocation3], 0  ;;  %s337_s0 = inlined_call_operand.hbm [shape: f32[1,2,16], index: 0, kind: input, shape index: {}]   ;;  %s338_s1 = inlined_call_operand.vmem [shape: f32[1,1,16], index: 1, kind: input, shape index: {}]   ;;  %s339_s2 = inlined_call_operand.vmem [shape: f32[1,1,128], index: 2, kind: input, shape index: {}]   ;;  %s340_s3 = inlined_call_operand.hbm [shape: f32[16,128], index: 3, kind: input, shape index: {}]   ;;  %s341_s4 = inlined_call_operand.hbm [shape: f32[2,128], index: 4, kind: output, shape index: {}]  }
   0x1   :  { %10 = vsyncpa [#allocation6], 0 }
   0x2   :  { %11 = vsyncpa [#allocation4], 0  ;;  %s255_s15 = smov [#allocation2]   ;;  %s256_s17 = smov [#allocation5]  }
   0x3   :  { %s18_s16 = sshll.u32 %s255_s15, 4  ;;  %s31_s18 = sshll.u32 %s256_s17, 4  ;;  %s19_s16 = int_to_ptr.vmem [resolvable:$true] %s18_s16  ;;  %s288_s18 = int_to_ptr.vmem [resolvable:$true] %s31_s18 }
   0x4   :  { %s183_s21 = scalar_lea.hbm %s337_s0, 32 }
   0x5   :  { %p184_p0 = scmp.ne.s32.totalorder %s337_s0, %s183_s21  ;;  %p187_p1 = scmp.lt.u32.totalorder %s183_s21, %s337_s0 }
   0x7   :  { %p189_p2 = pnand %p187_p1, %p184_p0 }
   0x9   :  { %192 = shalt.err (!%p189_p2)
}
   0xa   :  { %s193_s26 = scalar_lea.vmem %s19_s16, 32  ;;  %p198_p4 = scmp.lt.s32.totalorder %s19_s16, %s19_s16 }
   0xb   :  { %p194_p3 = scmp.ne.s32.totalorder %s19_s16, %s193_s26  ;;  %p199_p5 = scmp.lt.s32.totalorder %s193_s26, %s193_s26 }
   0xd   :  { %p200_p6 = por %p199_p5, %p198_p4 }
   0xf   :  { %p201_p7 = pnand %p200_p6, %p194_p3 }
  0x11   :  { %204 = shalt.err (!%p201_p7)
}
  0x12   :  { %21 = dma.hbm_to_vmem [thread:$0]  %s337_s0, 32, %s19_s16, [#allocation3]  }
  0x13   :  { %s205_s5 = scalar_lea.hbm %s340_s3, 256 }
  0x14   :  { %p206_p8 = scmp.ne.s32.totalorder %s340_s3, %s205_s5  ;;  %p209_p9 = scmp.lt.u32.totalorder %s205_s5, %s340_s3 }
  0x16   :  { %p211_p10 = pnand %p209_p9, %p206_p8 }
  0x18   :  { %214 = shalt.err (!%p211_p10)
}
  0x19   :  { %s215_s10 = scalar_lea.vmem %s288_s18, 256  ;;  %p220_p12 = scmp.lt.s32.totalorder %s288_s18, %s288_s18 }
  0x1a   :  { %p216_p11 = scmp.ne.s32.totalorder %s288_s18, %s215_s10  ;;  %p221_p13 = scmp.lt.s32.totalorder %s215_s10, %s215_s10 }
  0x1c   :  { %p222_p0 = por %p221_p13, %p220_p12 }
  0x1e   :  { %p223_p1 = pnand %p222_p0, %p216_p11 }
  0x20   :  { %226 = shalt.err (!%p223_p1)
}
  0x21   :  { %s257_s0 = smov 128   ;;  %s258_s11 = smov 8  }
  0x22   :  { %37 = dma.hbm_to_vmem [thread:$0]  %s340_s3, 256, %s288_s18, [#allocation6], %s257_s0, %s257_s0, %s258_s11  }
  0x23   :  { %249 = dma.done.wait [#allocation3], 32  }
  0x24   :  { %250 = vsyncadd [#allocation3], 4294967264 }
  0x25   :  { %251 = dma.done.wait [#allocation6], 256  }
  0x26   :  { %252 = vsyncadd [#allocation6], 4294967040  ;;  %v259_v0 = vmov 0.0|0.0   ;;  %vm260_vm0 = vmmov 0   ;;  %v261_v1 = vmov 0.0   ;;  %v53_v2 = vld [vmem:[#allocation5] sm:$0xff] }
  0x27   :  { %170 = vmatprep.subr.bf16.mxu0 %v259_v0  ;;  %167 = vmatprep.mubr.msk.f32.mxu0 %vm260_vm0, %v261_v1  ;;  %v54_v3 = vld [vmem:[#allocation5 + $0x8] sm:$0xff]  ;;  %v44_v4 = vld [vmem:[#allocation2] sm:$0x3]  ;;  %vm55_vm1 = vcmask 130048   ;;  %s262_s17 = smov [#allocation7]  }
  0x28   :  { %v171_v5 = vpack.c.bf16 %v54_v3, %v53_v2  ;;  %v157_v6 = vld [vmem:[%s338_s1] ss:$0 sm:$0xff]  ;;  %s147_s18 = sshll.u32 %s262_s17, 4  ;;  %s148_s18 = int_to_ptr.vmem [resolvable:$true] %s147_s18 }
  0x29   :  { %v52_v7 = vmul.f32 %v157_v6, %v44_v4  ;;  %v159_v8 = vld [vmem:[%s339_s2] ss:$0 sm:$0xff]  ;;  %s227_s1 = scalar_lea.vmem %s148_s18, 32  ;;  %p232_p3 = scmp.lt.s32.totalorder %s148_s18, %s148_s18 }
  0x2a   :  { %172 = vmatpush3.bf16.msra.mxu0 %v171_v5  ;;  %p228_p2 = scmp.ne.s32.totalorder %s148_s18, %s227_s1  ;;  %p233_p4 = scmp.lt.s32.totalorder %s227_s1, %s227_s1 }
  0x2c   :  { %p234_p5 = por %p233_p4, %p232_p3 }
  0x2d   :  { %168 = vmatmul.mubr.msk.f32.vlgmr.msra.gmra.mrb[0].mxu0 %vm55_vm1, %v52_v7 }
  0x2e   :  { %p235_p6 = pnand %p234_p5, %p228_p2 }
 0x100   :  { %v125_v9 = vpop.f32.mrb[0].mxu0 }
 0x101   :  { %v136_v10 = vsub.f32 %v125_v9, %v159_v8  ;;  %v169_v11 = vpop.f32.mrb[1].mxu0 }
 0x103   :  { %181 = vtanh.f32 %v136_v10 }
 0x10d   :  { %v182_v12 = vpop.eup %181 }
 0x10e   :  { %v138_v13 = vmul.f32 0.5, %v182_v12 }
 0x110   :  { %v139_v14 = vadd.f32 0.5, %v138_v13 }
 0x112   :  { %140 = vst [vmem:[#allocation7] sm:$0x3] %v139_v14 }
 0x113   :  { %238 = shalt.err (!%p235_p6)
}
 0x114   :  { %s239_s20 = scalar_lea.hbm %s341_s4, 32 }
 0x115   :  { %p240_p7 = scmp.ne.s32.totalorder %s341_s4, %s239_s20  ;;  %p243_p8 = scmp.lt.u32.totalorder %s239_s20, %s341_s4 }
 0x117   :  { %p245_p9 = pnand %p243_p8, %p240_p7 }
 0x119   :  { %248 = shalt.err (!%p245_p9)
}
 0x11a   :  { %150 = dma.vmem_to_hbm [thread:$0]  %s148_s18, 32, %s341_s4, [#allocation4]  }
 0x11b   :  { %253 = dma.done.wait [#allocation4], 32  }
 0x11c   :  { %254 = vsyncadd [#allocation4], 4294967264 }
 0x11d   :  { %154 = vsyncpa [#allocation3], 1 }
 0x11e   :  { %155 = vsyncpa [#allocation6], 1 }
 0x11f   :  { %156 = vsyncpa [#allocation4], 1 }

</bundles_post_ra>
